<compile_context>
chip_gen: v6e
topology: v6e:2x2x1
jax: 0.10.0
libtpu: 0.0.40
codegen_flags: <defaults>
</compile_context>

<pallas_src>
import functools
import math

import jax
import jax.numpy as jnp
from jax.experimental import pallas as pl
from jax.experimental.pallas import tpu as pltpu


def _gamma_kernel(gamma_ref, x_ref, o_ref):
    # gamma_ref: SMEM f32[1] (scalar prefetch).
    # Explicit exp(g * log(x)) avoids jnp.power's integer-exponent /
    # negative-base fixups. Images are expected in [0, 1): x == 0 gives
    # exp(-inf) == 0 for gamma > 0 (matches torch); x < 0 -> NaN (matches torch).
    o_ref[...] = jnp.exp(gamma_ref[0] * jnp.log(x_ref[...]))


_LANE_CANDIDATES = (4096, 2048, 1024, 512, 256, 128)


def _choose_layout(total):
    """Pick a lane-dense (rows, lanes, padded_total) layout.

    lanes is always a multiple of 128 (unmasked vst). If the element count is
    not divisible by 128, we pad the flat array (pad + slice in the wrapper)
    instead of emitting masked partial stores or oversized blocks.
    """
    for lanes in _LANE_CANDIDATES:
        if total % lanes == 0:
            return total // lanes, lanes, total
    lanes = 1024
    padded = ((total + lanes - 1) // lanes) * lanes
    return padded // lanes, lanes, padded


def _choose_block_rows(rows, lanes, dtype_bytes,
                       target_block_bytes=4 << 20, min_grid_steps=4):
    """Row tile: multiple of 8, ~4 MiB per block, and capped so large inputs
    produce at least `min_grid_steps` grid steps (v7x 2-TC sharding +
    pipelining). Safe on all generations with the 32 MiB scoped VMEM limit."""
    if rows <= 8:
        return rows
    max_rows = max(8, (target_block_bytes // (lanes * dtype_bytes)) // 8 * 8)
    cap_rows = rows
    if rows >= 8 * min_grid_steps:
        cap_rows = max(8, (rows // min_grid_steps) // 8 * 8)
    block_rows = min(rows, max_rows, cap_rows)
    if block_rows < rows:
        block_rows = max(8, (block_rows // 8) * 8)
    return block_rows


def _gamma_pallas_2d(x2, gamma_arr, block_rows, lanes):
    rows = x2.shape[0]
    grid = (pl.cdiv(rows, block_rows),)
    total = rows * lanes
    cost = pl.CostEstimate(
        flops=total,                     # 1 mul per element
        transcendentals=2 * total,       # exp + log per element
        bytes_accessed=2 * total * x2.dtype.itemsize,  # f32 read + write
    )
    return pl.pallas_call(
        _gamma_kernel,
        out_shape=jax.ShapeDtypeStruct(x2.shape, x2.dtype),
        grid_spec=pltpu.PrefetchScalarGridSpec(
            num_scalar_prefetch=1,
            grid=grid,
            in_specs=[pl.BlockSpec((block_rows, lanes), lambda i, g: (i, 0))],
            out_specs=pl.BlockSpec((block_rows, lanes), lambda i, g: (i, 0)),
        ),
        compiler_params=pltpu.CompilerParams(
            # "parallel" keeps the row axis megacore-shardable on v7x and is a
            # no-op on single-TC v5e/v6e.
            dimension_semantics=("parallel",),
            vmem_limit_bytes=32 * 1024 * 1024,  # safe on all gens incl. v7x
        ),
        cost_estimate=cost,
    )(gamma_arr, x2)


def random_gamma_pallas(x, gamma, apply_flag):
    """Elementwise x**gamma as a Pallas TPU kernel, or a zero-cost identity.

    x: float32 array (NCHW in this module; any shape accepted)
    gamma: scalar float32
    apply_flag: scalar int32 (1 -> apply gamma, 0 -> identity)
    """
    orig_shape = x.shape
    orig_dtype = x.dtype
    total = math.prod(orig_shape)
    rows, lanes, padded = _choose_layout(total)
    block_rows = _choose_block_rows(rows, lanes, jnp.dtype(orig_dtype).itemsize)
    gamma_arr = jnp.reshape(jnp.asarray(gamma, jnp.float32), (1,))

    def _apply(xin):
        flat = xin.reshape(-1)
        if padded != total:
            # Pad with 1.0 (1**g == 1, no NaN noise); padded tail is sliced off.
            flat = jnp.concatenate(
                [flat, jnp.ones((padded - total,), dtype=orig_dtype)])
        x2 = flat.reshape(rows, lanes)
        out2 = _gamma_pallas_2d(x2, gamma_arr, block_rows, lanes)
        out_flat = out2.reshape(-1)
        if padded != total:
            out_flat = out_flat[:total]
        return out_flat.reshape(orig_shape)

    def _skip(xin):
        return xin

    # Identity at the XLA level: the skip path moves no HBM bytes at all.
    return jax.lax.cond(apply_flag == 1, _apply, _skip, x)


@functools.partial(jax.jit, static_argnames=("p", "log_gamma_range"))
def random_gamma(x, key, p=0.5, log_gamma_range=(-0.3, 0.3)):
    """Full RandomGamma forward: sample the Bernoulli decision + gamma with
    jax.random (glue; host-side torch.rand has no Pallas equivalent), then run
    the elementwise power in the Pallas kernel (or skip it entirely)."""
    k_apply, k_gamma = jax.random.split(key)
    u_apply = jax.random.uniform(k_apply, ())
    u_gamma = jax.random.uniform(k_gamma, ())
    log_gamma = u_gamma * (log_gamma_range[1] - log_gamma_range[0]) + log_gamma_range[0]
    gamma = jnp.exp(log_gamma)
    apply_flag = (u_apply < p).astype(jnp.int32)
    return random_gamma_pallas(x, gamma, apply_flag)


if __name__ == "__main__":
    key = jax.random.PRNGKey(0)
    k_x, k_aug = jax.random.split(key)

    # Small image batch: N=2, C=4, H=W=16, values in [0, 1) (image-like, >= 0)
    x = jax.random.uniform(k_x, (2, 4, 16, 16), dtype=jnp.float32)

    out = random_gamma(x, k_aug, p=0.5, log_gamma_range=(-0.3, 0.3))
    out = jax.block_until_ready(out)

    # Reference check against plain-JAX semantics of the same sampled values.
    k_apply, k_gamma = jax.random.split(k_aug)
    u_apply = jax.random.uniform(k_apply, ())
    u_gamma = jax.random.uniform(k_gamma, ())
    log_gamma = u_gamma * 0.6 - 0.3
    gamma = jnp.exp(log_gamma)
    ref = jnp.where(u_apply < 0.5, x ** gamma, x)
    assert out.shape == x.shape and out.dtype == x.dtype
    assert jnp.allclose(out, ref, rtol=1e-5, atol=1e-5)

    # Also exercise the "always apply" path explicitly to hit the kernel.
    out_apply = jax.block_until_ready(
        random_gamma_pallas(x, jnp.float32(gamma), jnp.int32(1)))
    assert jnp.allclose(out_apply, x ** gamma, rtol=1e-5, atol=1e-5)

    print("KERNEL_OK")
</pallas_src>

<mosaic_0001>
module attributes {stable_mosaic.version = 11 : i64} {
  func.func @_gamma_kernel(%arg0: i32, %arg1: memref<1xf32, #tpu.memory_space<smem>>, %arg2: memref<1x2048xf32, #tpu.memory_space<vmem>>, %arg3: memref<1x2048xf32, #tpu.memory_space<vmem>>) attributes {dimension_semantics = [#tpu.dimension_semantics<parallel>], iteration_bounds = array<i64: 1>, scalar_prefetch = 1 : i64, scratch_operands = 0 : i64, tpu.core_type = #tpu.core_type<tc>, window_params = [{transform_indices = @transform_0, window_bounds = array<i64: 1, 2048>}, {transform_indices = @transform_1, window_bounds = array<i64: 1, 2048>}]} {
    %c0 = arith.constant 0 : index
    %0 = memref.load %arg1[%c0] : memref<1xf32, #tpu.memory_space<smem>>
    %c0_0 = arith.constant 0 : index
    %c0_1 = arith.constant 0 : index
    %1 = vector.load %arg2[%c0_0, %c0_1] : memref<1x2048xf32, #tpu.memory_space<vmem>>, vector<1x2048xf32>
    %2 = math.log %1 : vector<1x2048xf32>
    %3 = vector.broadcast %0 : f32 to vector<1x2048xf32>
    %4 = arith.mulf %3, %2 : vector<1x2048xf32>
    %5 = math.exp %4 : vector<1x2048xf32>
    %c0_2 = arith.constant 0 : index
    %c0_3 = arith.constant 0 : index
    %6 = vector.load %arg3[%c0_2, %c0_3] : memref<1x2048xf32, #tpu.memory_space<vmem>>, vector<1x2048xf32>
    tpu.vector_store %arg3[%c0_2, %c0_3], %5 {strides = array<i32>} : memref<1x2048xf32, #tpu.memory_space<vmem>>, vector<1x2048xf32>,
    return
  }
  func.func @transform_0(%arg0: i32, %arg1: memref<1xf32, #tpu.memory_space<smem>>) -> (i32, i32) {
    %c0_i32 = arith.constant 0 : i32
    %c0_i32_0 = arith.constant 0 : i32
    return %arg0, %c0_i32 : i32, i32
  }
  func.func @transform_1(%arg0: i32, %arg1: memref<1xf32, #tpu.memory_space<smem>>) -> (i32, i32) {
    %c0_i32 = arith.constant 0 : i32
    %c0_i32_0 = arith.constant 0 : i32
    return %arg0, %c0_i32 : i32, i32
  }
}

</mosaic_0001>

<bundles_post_ra>
// kernel: branch_1_fun.1
= control target key start
LH: loop header
LB: loop body
LE: loop exit
PB: predicated region body
PF: predicated region fallthrough
CT: control target
= control target key end

     0   :  { %s68_s1 = inlined_call_operand.vmem [shape: f32[1,2048], index: 1, kind: input, shape index: {}]   ;;  %s69_s0 = inlined_call_operand.<no memory space> [shape: f32[1], index: 0, kind: input, shape index: {}]   ;;  %s70_s2 = inlined_call_operand.vmem [shape: f32[1,2048], index: 2, kind: output, shape index: {}]  }
   0x1   :  { %v11_v0 = vld [vmem:[%s68_s1] sm:$0xff]  ;;  %v12_v1 = vld [vmem:[%s68_s1 + $0x8] sm:$0xff]  ;;  %v17_v3 = vstv %s69_s0 }
   0x2   :  { %30 = vlog2.f32 %v11_v0 }
   0x3   :  { %32 = vlog2.f32 %v12_v1 }
   0xf   :  { %v31_v2 = vpop.eup %30 }
  0x10   :  { %v33_v4 = vpop.eup %32  ;;  %v14_v5 = vmul.f32 0.6931472, %v31_v2 }
  0x11   :  { %v16_v6 = vmul.f32 0.6931472, %v33_v4 }
  0x12   :  { %v18_v7 = vmul.f32 %v17_v3, %v14_v5 }
  0x13   :  { %v19_v8 = vmul.f32 %v17_v3, %v16_v6 }
  0x14   :  { %v20_v9 = vmul.f32 1.442695, %v18_v7 }
  0x15   :  { %v22_v10 = vmul.f32 1.442695, %v19_v8 }
  0x16   :  { %34 = vpow2.f32 %v20_v9 }
  0x17   :  { %36 = vpow2.f32 %v22_v10 }
  0x23   :  { %v35_v11 = vpop.eup %34 }
  0x24   :  { %v37_v12 = vpop.eup %36  ;;  %24 = vst [vmem:[%s70_s2] sm:$0xff] %v35_v11 }
  0x25   :  { %25 = vst [vmem:[%s70_s2 + $0x8] sm:$0xff] %v37_v12 }

</bundles_post_ra>
